<compile_context>
chip_gen: v5e
topology: v5e:2x2
jax: 0.10.0
libtpu: 0.0.40
codegen_flags: <defaults>
</compile_context>

<pallas_src>
import functools
import math

import jax
import jax.numpy as jnp
from jax import lax
from jax.experimental import pallas as pl
from jax.experimental.pallas import tpu as pltpu

_MASK_VALUE = -1.0e30  # finite "minus infinity": avoids inf-inf -> NaN paths


# ----------------------------------------------------------------------------
# helpers
# ----------------------------------------------------------------------------
def _pick_tile(dim, target, align):
    """Largest tile <= target that divides `dim` and is a multiple of `align`.
    Falls back to the full dimension (always a legal TPU block)."""
    if dim <= target:
        return dim
    t = (target // align) * align
    while t >= align:
        if dim % t == 0:
            return t
        t -= align
    return dim


def _auto_tq(S, n_head, target_rows):
    """Pick tq dividing S with tq*n_head sublane-aligned and <= target_rows."""
    legal = [c for c in range(1, S + 1)
             if S % c == 0 and ((c * n_head) % 8 == 0 or c * n_head == S * n_head)]
    small = [c for c in legal if c * n_head <= target_rows]
    return max(small) if small else min(legal)


def _vmem_limit(est_bytes):
    """Explicit scoped-VMEM limit (default scoped limit, not physical VMEM,
    gates double-buffered tile sizes: 16MiB v5e / 32MiB v6e,v7x)."""
    return int(min(max(2 * est_bytes, 32 * 1024 * 1024), 64 * 1024 * 1024))


# ----------------------------------------------------------------------------
# Kernel 1: fused q/k/v projection GEMM.
#   One pass over x; three outputs (q, k, v) written directly in compute dtype
#   (no concatenated weight, no HBM column-slice round trip).
# ----------------------------------------------------------------------------
def _qkv_kernel(x_ref, wq_ref, wk_ref, wv_ref, bq_ref, bk_ref, bv_ref,
                q_ref, k_ref, v_ref, accq, acck, accv):
    @pl.when(pl.program_id(1) == 0)
    def _():
        accq[...] = jnp.zeros_like(accq)
        acck[...] = jnp.zeros_like(acck)
        accv[...] = jnp.zeros_like(accv)

    x = x_ref[...]  # already in compute dtype (bf16/f32) — no per-step cast
    accq[...] += jnp.dot(x, wq_ref[...], preferred_element_type=jnp.float32)
    acck[...] += jnp.dot(x, wk_ref[...], preferred_element_type=jnp.float32)
    accv[...] += jnp.dot(x, wv_ref[...], preferred_element_type=jnp.float32)

    @pl.when(pl.program_id(1) == pl.num_programs(1) - 1)
    def _():
        q_ref[...] = (accq[...] + bq_ref[...]).astype(q_ref.dtype)
        k_ref[...] = (acck[...] + bk_ref[...]).astype(k_ref.dtype)
        v_ref[...] = (accv[...] + bv_ref[...]).astype(v_ref.dtype)


def qkv_projection(x2d, wq, wk, wv, bq, bk, bv, *, tm=512, tk=1024):
    """x2d: (M, E) @ [wq (E,H*D), wk (E,D), wv (E,D)] -> (q, k, v) in x2d.dtype."""
    M, K = x2d.shape
    HD = wq.shape[1]
    D = wk.shape[1]
    out_dtype = x2d.dtype
    in_isz = jnp.dtype(x2d.dtype).itemsize
    align_m = 16 if in_isz == 2 else 8        # bf16 sublane packing
    tm = _pick_tile(M, tm, align_m)
    tk = _pick_tile(K, tk, 128)
    grid = (M // tm, K // tk)

    n_cols = HD + 2 * D
    est = (2 * (tm * tk + tk * n_cols) * in_isz   # double-buffered x + weights
           + 2 * tm * n_cols * in_isz             # output blocks
           + tm * n_cols * 4                      # f32 accumulators
           + n_cols * 4)                          # biases

    q, k, v = pl.pallas_call(
        _qkv_kernel,
        out_shape=(jax.ShapeDtypeStruct((M, HD), out_dtype),
                   jax.ShapeDtypeStruct((M, D), out_dtype),
                   jax.ShapeDtypeStruct((M, D), out_dtype)),
        grid=grid,
        in_specs=[
            pl.BlockSpec((tm, tk), lambda i, kk: (i, kk)),
            pl.BlockSpec((tk, HD), lambda i, kk: (kk, 0)),
            pl.BlockSpec((tk, D), lambda i, kk: (kk, 0)),
            pl.BlockSpec((tk, D), lambda i, kk: (kk, 0)),
            pl.BlockSpec((1, HD), lambda i, kk: (0, 0)),
            pl.BlockSpec((1, D), lambda i, kk: (0, 0)),
            pl.BlockSpec((1, D), lambda i, kk: (0, 0)),
        ],
        out_specs=(
            pl.BlockSpec((tm, HD), lambda i, kk: (i, 0)),
            pl.BlockSpec((tm, D), lambda i, kk: (i, 0)),
            pl.BlockSpec((tm, D), lambda i, kk: (i, 0)),
        ),
        scratch_shapes=[pltpu.VMEM((tm, HD), jnp.float32),
                        pltpu.VMEM((tm, D), jnp.float32),
                        pltpu.VMEM((tm, D), jnp.float32)],
        compiler_params=pltpu.CompilerParams(
            dimension_semantics=("parallel", "arbitrary"),
            vmem_limit_bytes=_vmem_limit(est)),
    )(x2d, wq, wk, wv, bq.reshape(1, HD), bk.reshape(1, D), bv.reshape(1, D))
    return q, k, v


# ----------------------------------------------------------------------------
# Kernel 2: generic tiled linear (matmul + bias) — used for out_proj.
# ----------------------------------------------------------------------------
def _linear_kernel(x_ref, w_ref, b_ref, o_ref, acc_ref):
    @pl.when(pl.program_id(2) == 0)
    def _():
        acc_ref[...] = jnp.zeros_like(acc_ref)

    acc_ref[...] += jnp.dot(x_ref[...], w_ref[...],
                            preferred_element_type=jnp.float32)

    @pl.when(pl.program_id(2) == pl.num_programs(2) - 1)
    def _():
        o_ref[...] = (acc_ref[...] + b_ref[...]).astype(o_ref.dtype)


def linear(x2d, w, b, *, tm=512, tn=512, tk=1024, out_dtype=jnp.float32):
    """x2d: (M, K) @ w (K, N) + b (N,) -> (M, N) in out_dtype."""
    M, K = x2d.shape
    K2, N = w.shape
    assert K == K2
    in_isz = jnp.dtype(x2d.dtype).itemsize
    align_m = 16 if in_isz == 2 else 8
    tm = _pick_tile(M, tm, align_m)
    tn = _pick_tile(N, tn, 128)
    tk = _pick_tile(K, tk, 128)
    grid = (M // tm, N // tn, K // tk)

    est = (2 * (tm * tk + tk * tn) * in_isz
           + 2 * tm * tn * jnp.dtype(out_dtype).itemsize
           + tm * tn * 4 + tn * 4)

    return pl.pallas_call(
        _linear_kernel,
        out_shape=jax.ShapeDtypeStruct((M, N), out_dtype),
        grid=grid,
        in_specs=[
            pl.BlockSpec((tm, tk), lambda i, j, kk: (i, kk)),
            pl.BlockSpec((tk, tn), lambda i, j, kk: (kk, j)),
            pl.BlockSpec((1, tn), lambda i, j, kk: (0, j)),
        ],
        out_specs=pl.BlockSpec((tm, tn), lambda i, j, kk: (i, j)),
        scratch_shapes=[pltpu.VMEM((tm, tn), jnp.float32)],
        compiler_params=pltpu.CompilerParams(
            dimension_semantics=("parallel", "parallel", "arbitrary"),
            vmem_limit_bytes=_vmem_limit(est)),
    )(x2d, w, b.reshape(1, N))


# ----------------------------------------------------------------------------
# Kernel 3: blocked multi-query flash attention (causal, online softmax).
#   Q slab: (tq*H, D) rows ordered (query position, head), head fastest, so
#   one shared K/V tile serves all heads (multi-query) and there are no
#   physical transposes anywhere.  Q is expected PRE-SCALED by 1/sqrt(D).
# ----------------------------------------------------------------------------
def _mqa_flash_kernel(q_ref, k_ref, v_ref, o_ref, m_sc, l_sc, acc_sc,
                      *, tq, tkv, n_head):
    qi = pl.program_id(1)
    kj = pl.program_id(2)

    @pl.when(kj == 0)
    def _():
        m_sc[...] = jnp.full_like(m_sc, _MASK_VALUE)
        l_sc[...] = jnp.zeros_like(l_sc)
        acc_sc[...] = jnp.zeros_like(acc_sc)

    q_first = qi * tq             # first query position in this q block
    q_last = q_first + tq - 1     # last query position in this q block
    kv_first = kj * tkv           # first key position in this kv block
    kv_last = kv_first + tkv - 1  # last key position in this kv block

    def process(apply_mask):
        # Contract last dims of Q and K directly (no k.T materialization).
        s = lax.dot_general(q_ref[...], k_ref[...],
                            dimension_numbers=(((1,), (1,)), ((), ())),
                            preferred_element_type=jnp.float32)  # (tq*H, tkv)
        if apply_mask:  # only on diagonal-crossing blocks
            # slab row r is query position q_first + r // n_head
            q_pos = q_first + lax.broadcasted_iota(jnp.int32, s.shape, 0) // n_head
            k_pos = kv_first + lax.broadcasted_iota(jnp.int32, s.shape, 1)
            s = jnp.where(k_pos <= q_pos, s, _MASK_VALUE)

        m_prev = m_sc[...]
        m_new = jnp.maximum(m_prev, jnp.max(s, axis=-1, keepdims=True))
        alpha = jnp.exp(m_prev - m_new)
        p = jnp.exp(s - m_new)
        l_sc[...] = alpha * l_sc[...] + jnp.sum(p, axis=-1, keepdims=True)
        acc_sc[...] = alpha * acc_sc[...] + jnp.dot(
            p.astype(v_ref.dtype), v_ref[...], preferred_element_type=jnp.float32)
        m_sc[...] = m_new

    # Block fully below the diagonal: mask-free fast path.
    @pl.when(kv_last <= q_first)
    def _():
        process(False)

    # Block crossing the diagonal: apply the causal mask.
    @pl.when(jnp.logical_and(kv_last > q_first, kv_first <= q_last))
    def _():
        process(True)

    # Blocks entirely above the diagonal (kv_first > q_last) are skipped; the
    # clamped K/V index_map keeps their block index on the diagonal so skipped
    # steps issue no fresh DMA.

    @pl.when(kj == pl.num_programs(2) - 1)
    def _():
        # Exact reciprocal: runs once per (b, q-block), essentially free.
        o_ref[...] = (acc_sc[...] * pl.reciprocal(l_sc[...], approx=False)
                      ).astype(o_ref.dtype)


def mqa_attention(q_slab, k, v, n_head, *, tq=None, tkv=None,
                  q_block_rows=512, kv_block=512):
    """q_slab: (B, S*H, D) head-fastest rows, PRE-SCALED by 1/sqrt(D).
    k, v: (B, S, D) shared across heads.  Returns (B, S*H, D) in q dtype."""
    B, SH, D = q_slab.shape
    S = k.shape[1]
    assert SH == S * n_head

    if tkv is None:
        tkv = _pick_tile(S, kv_block, 128)     # lane dim of the score tile
    else:
        assert S % tkv == 0 and (tkv % 8 == 0 or tkv == S)
    if tq is None:
        tq = _auto_tq(S, n_head, q_block_rows)
    else:
        assert S % tq == 0 and ((tq * n_head) % 8 == 0 or tq * n_head == SH)

    n_q = S // tq
    n_kv = S // tkv
    rows = tq * n_head

    def q_map(b, qi, kj):
        return (b, qi, 0)

    def kv_map(b, qi, kj):
        # clamp above-diagonal blocks to the diagonal block -> skipped grid
        # steps keep the same block index, so no useless K/V DMA is issued.
        diag = ((qi + 1) * tq - 1) // tkv
        return (b, jnp.minimum(kj, diag), 0)

    in_isz = jnp.dtype(q_slab.dtype).itemsize
    est = (2 * (rows * D + 2 * tkv * D) * in_isz   # double-buffered q/k/v tiles
           + 2 * rows * D * in_isz                 # output block
           + rows * (D + 2) * 4)                   # f32 m/l/acc scratch

    kernel = functools.partial(_mqa_flash_kernel, tq=tq, tkv=tkv, n_head=n_head)

    return pl.pallas_call(
        kernel,
        out_shape=jax.ShapeDtypeStruct((B, SH, D), q_slab.dtype),
        grid=(B, n_q, n_kv),
        in_specs=[
            pl.BlockSpec((None, rows, D), q_map),     # batch dim squeezed
            pl.BlockSpec((None, tkv, D), kv_map),
            pl.BlockSpec((None, tkv, D), kv_map),
        ],
        out_specs=pl.BlockSpec((None, rows, D), q_map),
        scratch_shapes=[
            pltpu.VMEM((rows, 1), jnp.float32),   # running max m
            pltpu.VMEM((rows, 1), jnp.float32),   # running sum l
            pltpu.VMEM((rows, D), jnp.float32),   # running acc
        ],
        compiler_params=pltpu.CompilerParams(
            dimension_semantics=("parallel", "parallel", "arbitrary"),
            vmem_limit_bytes=_vmem_limit(est)),
    )(q_slab, k, v)


# ----------------------------------------------------------------------------
# Parameters
# ----------------------------------------------------------------------------
def init_params(key, n_embd, n_head, head_dim):
    """Deterministic parameter init (weights stored as (in, out)), fp32."""
    ks = jax.random.split(key, 8)

    def w(k, fan_in, fan_out):
        bound = 1.0 / math.sqrt(fan_in)
        return jax.random.uniform(k, (fan_in, fan_out), jnp.float32, -bound, bound)

    def b(k, fan_in, fan_out):
        bound = 1.0 / math.sqrt(fan_in)
        return jax.random.uniform(k, (fan_out,), jnp.float32, -bound, bound)

    return {
        "q_w": w(ks[0], n_embd, n_head * head_dim), "q_b": b(ks[1], n_embd, n_head * head_dim),
        "k_w": w(ks[2], n_embd, head_dim),          "k_b": b(ks[3], n_embd, head_dim),
        "v_w": w(ks[4], n_embd, head_dim),          "v_b": b(ks[5], n_embd, head_dim),
        "o_w": w(ks[6], n_head * head_dim, n_embd), "o_b": b(ks[7], n_head * head_dim, n_embd),
    }


def prepare_params(params, n_head, compute_dtype=jnp.bfloat16):
    """One-time prep: fold 1/sqrt(D) into q_proj, cast weights to the MXU
    compute dtype (bf16 recommended); biases stay f32 (added in f32 epilogue).
    TODO(synk): on v7x, fp8 with per-tile scaling is an option for these GEMMs."""
    HD = params["q_w"].shape[1]
    D = HD // n_head
    scale = 1.0 / math.sqrt(D)
    return {
        "wq": (params["q_w"] * scale).astype(compute_dtype),
        "bq": params["q_b"] * scale,
        "wk": params["k_w"].astype(compute_dtype),
        "bk": params["k_b"],
        "wv": params["v_w"].astype(compute_dtype),
        "bv": params["v_b"],
        "wo": params["o_w"].astype(compute_dtype),
        "bo": params["o_b"],
    }


# ----------------------------------------------------------------------------
# FlashMHAModule forward (multi_query attention path)
# ----------------------------------------------------------------------------
def flash_mha_forward(prepared, x, n_head, *, attn_tq=None, attn_tkv=None,
                      lin_tm=512, lin_tn=512, lin_tk=1024):
    B, S, E = x.shape
    HD = prepared["wq"].shape[1]
    D = prepared["wk"].shape[1]
    compute_dtype = prepared["wq"].dtype

    # x is cast ONCE here; everything downstream stays in compute_dtype until
    # the final out_proj accumulates and writes f32.
    x2d = x.reshape(B * S, E).astype(compute_dtype)

    # Fused q/k/v projection: x read from HBM once, three direct outputs.
    q2d, k2d, v2d = qkv_projection(
        x2d, prepared["wq"], prepared["wk"], prepared["wv"],
        prepared["bq"], prepared["bk"], prepared["bv"], tm=lin_tm, tk=lin_tk)

    # Free reshapes only (row-major order is identical) — no transposes.
    q = q2d.reshape(B, S * n_head, D)   # (B, S*H, D), head-fastest rows
    k = k2d.reshape(B, S, D)
    v = v2d.reshape(B, S, D)

    attn = mqa_attention(q, k, v, n_head, tq=attn_tq, tkv=attn_tkv)  # (B, S*H, D)

    out = linear(attn.reshape(B * S, HD), prepared["wo"], prepared["bo"],
                 tm=lin_tm, tn=lin_tn, tk=lin_tk, out_dtype=jnp.float32)
    return out.reshape(B, S, E)


# ----------------------------------------------------------------------------
# Pure-JAX reference (mirrors the PyTorch MultiQueryAttention math, fp32)
# ----------------------------------------------------------------------------
def reference_forward(params, x, n_head):
    B, S, E = x.shape
    HD = params["q_w"].shape[1]
    D = HD // n_head
    q = (x @ params["q_w"] + params["q_b"]).reshape(B, S, n_head, D)
    k = (x @ params["k_w"] + params["k_b"]).reshape(B, S, 1, D)
    v = (x @ params["v_w"] + params["v_b"]).reshape(B, S, 1, D)
    k = jnp.broadcast_to(k, (B, S, n_head, D))
    v = jnp.broadcast_to(v, (B, S, n_head, D))
    q = jnp.transpose(q, (0, 2, 1, 3)) * (1.0 / math.sqrt(D))
    k = jnp.transpose(k, (0, 2, 1, 3))
    v = jnp.transpose(v, (0, 2, 1, 3))
    s = jnp.einsum("bhqd,bhkd->bhqk", q, k)
    mask = jnp.tril(jnp.ones((S, S)))[None, None]
    s = jnp.where(mask == 0, -jnp.inf, s)
    p = jax.nn.softmax(s, axis=-1)
    o = jnp.einsum("bhqk,bhkd->bhqd", p, v)
    o = jnp.transpose(o, (0, 2, 1, 3)).reshape(B, S, n_head * D)
    return o @ params["o_w"] + params["o_b"]


if __name__ == "__main__":
    key = jax.random.PRNGKey(0)

    def run_case(idx, B, S, E, H, compute_dtype, atol, **kw):
        pkey, xkey = jax.random.split(jax.random.fold_in(key, idx))
        D = E // H
        params = init_params(pkey, E, H, D)
        prepared = prepare_params(params, H, compute_dtype=compute_dtype)
        x = jax.random.normal(xkey, (B, S, E), dtype=jnp.float32)
        out = jax.block_until_ready(flash_mha_forward(prepared, x, H, **kw))
        ref = reference_forward(params, x, H)
        assert out.shape == (B, S, E)
        assert jnp.allclose(out, ref, atol=atol, rtol=atol), (
            f"case {idx}: max abs err {jnp.max(jnp.abs(out - ref))}")

    # 1) tiny single-block path (tiles collapse to full dims), fp32 compute
    run_case(0, B=2, S=8, E=32, H=4, compute_dtype=jnp.float32, atol=2e-3)
    # 2) multi-block flash path: (B, n_q, n_kv) grid with online softmax,
    #    diagonal-only causal masking, causal block skipping, tiled linear M.
    run_case(1, B=2, S=32, E=32, H=4, compute_dtype=jnp.float32, atol=2e-3,
             attn_tq=8, attn_tkv=8, lin_tm=16)
    # 3) same multi-block path carried end-to-end in bf16 (the production
    #    configuration per the perf review); looser tolerance for bf16.
    run_case(2, B=2, S=32, E=32, H=4, compute_dtype=jnp.bfloat16, atol=1e-1,
             attn_tq=8, attn_tkv=8, lin_tm=16)

    # TODO(synk): BlockSparseAttention uses torch.randperm-driven dynamic block
    # selection and the KVCache autoregressive path carries host-side mutable
    # state; only the multi_query (prefill) path of FlashMHAModule is
    # implemented here.
    print("KERNEL_OK")
</pallas_src>

<mosaic_0001>
module attributes {stable_mosaic.version = 11 : i64} {
  func.func @_qkv_kernel(%arg0: i32, %arg1: i32, %arg2: memref<16x32xf32, #tpu.memory_space<vmem>>, %arg3: memref<32x32xf32, #tpu.memory_space<vmem>>, %arg4: memref<32x8xf32, #tpu.memory_space<vmem>>, %arg5: memref<32x8xf32, #tpu.memory_space<vmem>>, %arg6: memref<1x32xf32, #tpu.memory_space<vmem>>, %arg7: memref<1x8xf32, #tpu.memory_space<vmem>>, %arg8: memref<1x8xf32, #tpu.memory_space<vmem>>, %arg9: memref<16x32xf32, #tpu.memory_space<vmem>>, %arg10: memref<16x8xf32, #tpu.memory_space<vmem>>, %arg11: memref<16x8xf32, #tpu.memory_space<vmem>>, %arg12: memref<16x32xf32, #tpu.memory_space<vmem>>, %arg13: memref<16x8xf32, #tpu.memory_space<vmem>>, %arg14: memref<16x8xf32, #tpu.memory_space<vmem>>) attributes {dimension_semantics = [#tpu.dimension_semantics<parallel>, #tpu.dimension_semantics<arbitrary>], iteration_bounds = array<i64: 1, 1>, scalar_prefetch = 0 : i64, scratch_operands = 3 : i64, tpu.core_type = #tpu.core_type<tc>, window_params = [{transform_indices = @transform_0, window_bounds = array<i64: 16, 32>}, {transform_indices = @transform_1, window_bounds = array<i64: 32, 32>}, {transform_indices = @transform_2, window_bounds = array<i64: 32, 8>}, {transform_indices = @transform_3, window_bounds = array<i64: 32, 8>}, {pipeline_mode = #tpu.pipeline_mode<synchronous>, transform_indices = @transform_4, window_bounds = array<i64: 1, 32>}, {pipeline_mode = #tpu.pipeline_mode<synchronous>, transform_indices = @transform_5, window_bounds = array<i64: 1, 8>}, {pipeline_mode = #tpu.pipeline_mode<synchronous>, transform_indices = @transform_6, window_bounds = array<i64: 1, 8>}, {transform_indices = @transform_7, window_bounds = array<i64: 16, 32>}, {transform_indices = @transform_8, window_bounds = array<i64: 16, 8>}, {transform_indices = @transform_9, window_bounds = array<i64: 16, 8>}]} {
    %c0_i32 = arith.constant 0 : i32
    %0 = arith.cmpi eq, %arg1, %c0_i32 : i32
    %1 = arith.extui %0 : i1 to i32
    %c0_i32_0 = arith.constant 0 : i32
    %2 = arith.cmpi ne, %1, %c0_i32_0 : i32
    scf.if %2 {
      %cst_24 = arith.constant 0.000000e+00 : f32
      %22 = vector.broadcast %cst_24 : f32 to vector<16x32xf32>
      %c0_25 = arith.constant 0 : index
      %c0_26 = arith.constant 0 : index
      %23 = vector.load %arg12[%c0_25, %c0_26] : memref<16x32xf32, #tpu.memory_space<vmem>>, vector<16x32xf32>
      tpu.vector_store %arg12[%c0_25, %c0_26], %22 {strides = array<i32>} : memref<16x32xf32, #tpu.memory_space<vmem>>, vector<16x32xf32>,
      %cst_27 = arith.constant 0.000000e+00 : f32
      %24 = vector.broadcast %cst_27 : f32 to vector<16x8xf32>
      %c0_28 = arith.constant 0 : index
      %c0_29 = arith.constant 0 : index
      %25 = vector.load %arg13[%c0_28, %c0_29] : memref<16x8xf32, #tpu.memory_space<vmem>>, vector<16x8xf32>
      tpu.vector_store %arg13[%c0_28, %c0_29], %24 {strides = array<i32>} : memref<16x8xf32, #tpu.memory_space<vmem>>, vector<16x8xf32>,
      %cst_30 = arith.constant 0.000000e+00 : f32
      %26 = vector.broadcast %cst_30 : f32 to vector<16x8xf32>
      %c0_31 = arith.constant 0 : index
      %c0_32 = arith.constant 0 : index
      %27 = vector.load %arg14[%c0_31, %c0_32] : memref<16x8xf32, #tpu.memory_space<vmem>>, vector<16x8xf32>
      tpu.vector_store %arg14[%c0_31, %c0_32], %26 {strides = array<i32>} : memref<16x8xf32, #tpu.memory_space<vmem>>, vector<16x8xf32>,
    } else {
    }
    %c0 = arith.constant 0 : index
    %c0_1 = arith.constant 0 : index
    %3 = vector.load %arg2[%c0, %c0_1] : memref<16x32xf32, #tpu.memory_space<vmem>>, vector<16x32xf32>
    %c0_2 = arith.constant 0 : index
    %c0_3 = arith.constant 0 : index
    %4 = vector.load %arg12[%c0_2, %c0_3] : memref<16x32xf32, #tpu.memory_space<vmem>>, vector<16x32xf32>
    %c0_4 = arith.constant 0 : index
    %c0_5 = arith.constant 0 : index
    %5 = vector.load %arg3[%c0_4, %c0_5] : memref<32x32xf32, #tpu.memory_space<vmem>>, vector<32x32xf32>
    %cst = arith.constant dense<0.000000e+00> : vector<16x32xf32>
    %6 = tpu.matmul %3, %5, %cst {dimension_numbers = #tpu.dot_dimension_numbers<[1], [0], [0], [1], [0, 0, 1, 1], [], []>} : vector<16x32xf32>, vector<32x32xf32>, vector<16x32xf32> -> vector<16x32xf32>
    %7 = arith.addf %4, %6 : vector<16x32xf32>
    %c0_6 = arith.constant 0 : index
    %c0_7 = arith.constant 0 : index
    %8 = vector.load %arg12[%c0_6, %c0_7] : memref<16x32xf32, #tpu.memory_space<vmem>>, vector<16x32xf32>
    tpu.vector_store %arg12[%c0_6, %c0_7], %7 {strides = array<i32>} : memref<16x32xf32, #tpu.memory_space<vmem>>, vector<16x32xf32>,
    %c0_8 = arith.constant 0 : index
    %c0_9 = arith.constant 0 : index
    %9 = vector.load %arg13[%c0_8, %c0_9] : memref<16x8xf32, #tpu.memory_space<vmem>>, vector<16x8xf32>
    %c0_10 = arith.constant 0 : index
    %c0_11 = arith.constant 0 : index
    %10 = vector.load %arg4[%c0_10, %c0_11] : memref<32x8xf32, #tpu.memory_space<vmem>>, vector<32x8xf32>
    %cst_12 = arith.constant dense<0.000000e+00> : vector<16x8xf32>
    %11 = tpu.matmul %3, %10, %cst_12 {dimension_numbers = #tpu.dot_dimension_numbers<[1], [0], [0], [1], [0, 0, 1, 1], [], []>} : vector<16x32xf32>, vector<32x8xf32>, vector<16x8xf32> -> vector<16x8xf32>
    %12 = arith.addf %9, %11 : vector<16x8xf32>
    %c0_13 = arith.constant 0 : index
    %c0_14 = arith.constant 0 : index
    %13 = vector.load %arg13[%c0_13, %c0_14] : memref<16x8xf32, #tpu.memory_space<vmem>>, vector<16x8xf32>
    tpu.vector_store %arg13[%c0_13, %c0_14], %12 {strides = array<i32>} : memref<16x8xf32, #tpu.memory_space<vmem>>, vector<16x8xf32>,
    %c0_15 = arith.constant 0 : index
    %c0_16 = arith.constant 0 : index
    %14 = vector.load %arg14[%c0_15, %c0_16] : memref<16x8xf32, #tpu.memory_space<vmem>>, vector<16x8xf32>
    %c0_17 = arith.constant 0 : index
    %c0_18 = arith.constant 0 : index
    %15 = vector.load %arg5[%c0_17, %c0_18] : memref<32x8xf32, #tpu.memory_space<vmem>>, vector<32x8xf32>
    %cst_19 = arith.constant dense<0.000000e+00> : vector<16x8xf32>
    %16 = tpu.matmul %3, %15, %cst_19 {dimension_numbers = #tpu.dot_dimension_numbers<[1], [0], [0], [1], [0, 0, 1, 1], [], []>} : vector<16x32xf32>, vector<32x8xf32>, vector<16x8xf32> -> vector<16x8xf32>
    %17 = arith.addf %14, %16 : vector<16x8xf32>
    %c0_20 = arith.constant 0 : index
    %c0_21 = arith.constant 0 : index
    %18 = vector.load %arg14[%c0_20, %c0_21] : memref<16x8xf32, #tpu.memory_space<vmem>>, vector<16x8xf32>
    tpu.vector_store %arg14[%c0_20, %c0_21], %17 {strides = array<i32>} : memref<16x8xf32, #tpu.memory_space<vmem>>, vector<16x8xf32>,
    %c0_i32_22 = arith.constant 0 : i32
    %19 = arith.cmpi eq, %arg1, %c0_i32_22 : i32
    %20 = arith.extui %19 : i1 to i32
    %c0_i32_23 = arith.constant 0 : i32
    %21 = arith.cmpi ne, %20, %c0_i32_23 : i32
    scf.if %21 {
      %c0_24 = arith.constant 0 : index
      %c0_25 = arith.constant 0 : index
      %22 = vector.load %arg12[%c0_24, %c0_25] : memref<16x32xf32, #tpu.memory_space<vmem>>, vector<16x32xf32>
      %c0_26 = arith.constant 0 : index
      %c0_27 = arith.constant 0 : index
      %23 = vector.load %arg6[%c0_26, %c0_27] : memref<1x32xf32, #tpu.memory_space<vmem>>, vector<1x32xf32>
      %24 = vector.broadcast %23 : vector<1x32xf32> to vector<16x32xf32>
      %25 = arith.addf %22, %24 : vector<16x32xf32>
      %c0_28 = arith.constant 0 : index
      %c0_29 = arith.constant 0 : index
      %26 = vector.load %arg9[%c0_28, %c0_29] : memref<16x32xf32, #tpu.memory_space<vmem>>, vector<16x32xf32>
      tpu.vector_store %arg9[%c0_28, %c0_29], %25 {strides = array<i32>} : memref<16x32xf32, #tpu.memory_space<vmem>>, vector<16x32xf32>,
      %c0_30 = arith.constant 0 : index
      %c0_31 = arith.constant 0 : index
      %27 = vector.load %arg13[%c0_30, %c0_31] : memref<16x8xf32, #tpu.memory_space<vmem>>, vector<16x8xf32>
      %c0_32 = arith.constant 0 : index
      %c0_33 = arith.constant 0 : index
      %28 = vector.load %arg7[%c0_32, %c0_33] : memref<1x8xf32, #tpu.memory_space<vmem>>, vector<1x8xf32>
      %29 = vector.broadcast %28 : vector<1x8xf32> to vector<16x8xf32>
      %30 = arith.addf %27, %29 : vector<16x8xf32>
      %c0_34 = arith.constant 0 : index
      %c0_35 = arith.constant 0 : index
      %31 = vector.load %arg10[%c0_34, %c0_35] : memref<16x8xf32, #tpu.memory_space<vmem>>, vector<16x8xf32>
      tpu.vector_store %arg10[%c0_34, %c0_35], %30 {strides = array<i32>} : memref<16x8xf32, #tpu.memory_space<vmem>>, vector<16x8xf32>,
      %c0_36 = arith.constant 0 : index
      %c0_37 = arith.constant 0 : index
      %32 = vector.load %arg14[%c0_36, %c0_37] : memref<16x8xf32, #tpu.memory_space<vmem>>, vector<16x8xf32>
      %c0_38 = arith.constant 0 : index
      %c0_39 = arith.constant 0 : index
      %33 = vector.load %arg8[%c0_38, %c0_39] : memref<1x8xf32, #tpu.memory_space<vmem>>, vector<1x8xf32>
      %34 = vector.broadcast %33 : vector<1x8xf32> to vector<16x8xf32>
      %35 = arith.addf %32, %34 : vector<16x8xf32>
      %c0_40 = arith.constant 0 : index
      %c0_41 = arith.constant 0 : index
      %36 = vector.load %arg11[%c0_40, %c0_41] : memref<16x8xf32, #tpu.memory_space<vmem>>, vector<16x8xf32>
      tpu.vector_store %arg11[%c0_40, %c0_41], %35 {strides = array<i32>} : memref<16x8xf32, #tpu.memory_space<vmem>>, vector<16x8xf32>,
    } else {
    }
    return
  }
  func.func @transform_0(%arg0: i32, %arg1: i32) -> (i32, i32) {
    %c0_i32 = arith.constant 0 : i32
    return %arg0, %arg1 : i32, i32
  }
  func.func @transform_1(%arg0: i32, %arg1: i32) -> (i32, i32) {
    %c0_i32 = arith.constant 0 : i32
    %c0_i32_0 = arith.constant 0 : i32
    return %arg1, %c0_i32 : i32, i32
  }
  func.func @transform_2(%arg0: i32, %arg1: i32) -> (i32, i32) {
    %c0_i32 = arith.constant 0 : i32
    %c0_i32_0 = arith.constant 0 : i32
    return %arg1, %c0_i32 : i32, i32
  }
  func.func @transform_3(%arg0: i32, %arg1: i32) -> (i32, i32) {
    %c0_i32 = arith.constant 0 : i32
    %c0_i32_0 = arith.constant 0 : i32
    return %arg1, %c0_i32 : i32, i32
  }
  func.func @transform_4(%arg0: i32, %arg1: i32) -> (i32, i32) {
    %c0_i32 = arith.constant 0 : i32
    %c0_i32_0 = arith.constant 0 : i32
    %c0_i32_1 = arith.constant 0 : i32
    return %c0_i32, %c0_i32_0 : i32, i32
  }
  func.func @transform_5(%arg0: i32, %arg1: i32) -> (i32, i32) {
    %c0_i32 = arith.constant 0 : i32
    %c0_i32_0 = arith.constant 0 : i32
    %c0_i32_1 = arith.constant 0 : i32
    return %c0_i32, %c0_i32_0 : i32, i32
  }
  func.func @transform_6(%arg0: i32, %arg1: i32) -> (i32, i32) {
    %c0_i32 = arith.constant 0 : i32
    %c0_i32_0 = arith.constant 0 : i32
    %c0_i32_1 = arith.constant 0 : i32
    return %c0_i32, %c0_i32_0 : i32, i32
  }
  func.func @transform_7(%arg0: i32, %arg1: i32) -> (i32, i32) {
    %c0_i32 = arith.constant 0 : i32
    %c0_i32_0 = arith.constant 0 : i32
    return %arg0, %c0_i32 : i32, i32
  }
  func.func @transform_8(%arg0: i32, %arg1: i32) -> (i32, i32) {
    %c0_i32 = arith.constant 0 : i32
    %c0_i32_0 = arith.constant 0 : i32
    return %arg0, %c0_i32 : i32, i32
  }
  func.func @transform_9(%arg0: i32, %arg1: i32) -> (i32, i32) {
    %c0_i32 = arith.constant 0 : i32
    %c0_i32_0 = arith.constant 0 : i32
    return %arg0, %c0_i32 : i32, i32
  }
}

</mosaic_0001>

<bundles_post_ra>
// kernel: tpu_custom_call.1
= control target key start
LH: loop header
LB: loop body
LE: loop exit
PB: predicated region body
PF: predicated region fallthrough
CT: control target
= control target key end

     0   :  { %vm37_vm0 = vcmask 64512   ;;  %vm34_vm1 = vcmask 261120   ;;  %v253_v4 = vmov 0.0   ;;  %s397_s0 = inlined_call_operand.vmem [shape: f32[16,32], index: 0, kind: input, shape index: {}]   ;;  %s398_s1 = inlined_call_operand.vmem [shape: f32[32,32], index: 1, kind: input, shape index: {}]   ;;  %s399_s2 = inlined_call_operand.vmem [shape: f32[32,8], index: 2, kind: input, shape index: {}]   ;;  %s400_s3 = inlined_call_operand.vmem [shape: f32[32,8], index: 3, kind: input, shape index: {}]   ;;  %s401_s4 = inlined_call_operand.vmem [shape: f32[1,32], index: 4, kind: input, shape index: {}]   ;;  %s402_s5 = inlined_call_operand.vmem [shape: f32[1,8], index: 5, kind: input, shape index: {}]   ;;  %s403_s6 = inlined_call_operand.vmem [shape: f32[1,8], index: 6, kind: input, shape index: {}]   ;;  %s404_s7 = inlined_call_operand.hbm [shape: f32[16,32], index: 7, kind: output, shape index: {0}]   ;;  %s405_s8 = inlined_call_operand.vmem [shape: f32[16,8], index: 8, kind: output, shape index: {1}]   ;;  %s406_s9 = inlined_call_operand.vmem [shape: f32[16,8], index: 9, kind: output, shape index: {2}]  }
   0x1   :  { %v123_v0 = vld [vmem:[%s400_s3 + $0x18] sm:$0xff]  ;;  %v122_v1 = vld [vmem:[%s400_s3 + $0x10] sm:$0xff]  ;;  %38 = vst.msk [vmem:[#allocation3] sm:$0xff] %vm37_vm0, %v253_v4  ;;  %v121_v5 = vld [vmem:[%s400_s3 + $0x8] sm:$0xff] }
   0x2   :  { %136 = vmatpush.msra.mxu2 %v123_v0  ;;  %v89_v2 = vld [vmem:[%s399_s2 + $0x18] sm:$0xff]  ;;  %v88_v6 = vld [vmem:[%s399_s2 + $0x10] sm:$0xff]  ;;  %35 = vst.msk [vmem:[#allocation2] sm:$0xff] %vm34_vm1, %v253_v4  ;;  %v87_v8 = vld [vmem:[%s399_s2 + $0x8] sm:$0xff] }
   0x3   :  { %v49_v3 = vld [vmem:[%s398_s1 + $0x18] sm:$0xff]  ;;  %102 = vmatpush.msra.mxu1 %v89_v2  ;;  %v48_v7 = vld [vmem:[%s398_s1 + $0x10] sm:$0xff]  ;;  %v47_v9 = vld [vmem:[%s398_s1 + $0x8] sm:$0xff]  ;;  %36 = vst.msk [vmem:[#allocation2 + $0x8] sm:$0xff] %vm34_vm1, %v253_v4 }
   0x4   :  { %216 = vmatpush.msra.mxu3 %v49_v3  ;;  %137 = vmatpush.msra.mxu2 %v122_v1  ;;  %v120_v10 = vld [vmem:[%s400_s3] sm:$0xff]  ;;  %39 = vst.msk [vmem:[#allocation3 + $0x8] sm:$0xff] %vm37_vm0, %v253_v4 }
   0x5   :  { %69 = vmatpush.msra.mxu0 %v49_v3  ;;  %v42_v11 = vld [vmem:[%s397_s0] sm:$0xff]  ;;  %103 = vmatpush.msra.mxu1 %v88_v6  ;;  %40 = vst.msk [vmem:[#allocation4] sm:$0xff] %vm37_vm0, %v253_v4 }
   0x6   :  { %217 = vmatpush.msra.mxu3 %v48_v7  ;;  %138 = vmatpush.msra.mxu2 %v121_v5  ;;  %v86_v12 = vld [vmem:[%s399_s2] sm:$0xff] }
   0x7   :  { %70 = vmatpush.msra.mxu0 %v48_v7 }
   0x8   :  { %15 = vsyncpa [#allocation6], 0  ;;  %104 = vmatpush.msra.mxu1 %v87_v8  ;;  %218 = vmatpush.msra.mxu3 %v47_v9  ;;  %v46_v13 = vld [vmem:[%s398_s1] sm:$0xff]  ;;  %41 = vst.msk [vmem:[#allocation4 + $0x8] sm:$0xff] %vm37_vm0, %v253_v4  ;;  %v43_v14 = vld [vmem:[%s397_s0 + $0x8] sm:$0xff]  ;;  %s190_s22 = sshll.u32 %s404_s7, 4  ;;  %s191_s22 = int_to_ptr.hbm [resolvable:$true] %s190_s22 }
   0x9   :  { %139 = vmatpush.msra.mxu2 %v120_v10  ;;  %71 = vmatpush.msra.mxu0 %v47_v9  ;;  %v84_v15 = vld [vmem:[#allocation3] sm:$0xff]  ;;  %v44_v17 = vld [vmem:[#allocation2] sm:$0xff]  ;;  %s255_s7 = smov 128   ;;  %s256_s26 = smov 8  }
   0xa   :  { %214 = vmatmul.msk.f32.vlgmr.msra.gmra.mxu2 %vm34_vm1, %v42_v11  ;;  %105 = vmatpush.msra.mxu1 %v86_v12  ;;  %v45_v23 = vld [vmem:[#allocation2 + $0x8] sm:$0xff]  ;;  %v224_v26 = vld [vmem:[%s402_s5] ss:$0 sm:$0xff] }
   0xb   :  { %219 = vmatpush.msra.mxu3 %v46_v13  ;;  %212 = vmatmul.msk.f32.vlgmr.msra.gmra.mxu1 %vm34_vm1, %v42_v11  ;;  %v85_v25 = vld [vmem:[#allocation3 + $0x8] sm:$0xff]  ;;  %v226_v31 = vld [vmem:[%s401_s4] ss:$0 sm:$0xff]  ;;  %s254_s4 = smov [#allocation5]  }
   0xc   :  { %211 = vmatmul.msk.f32.vlgmr.msra.gmra.mxu3 %vm34_vm1, %v43_v14  ;;  %72 = vmatpush.msra.mxu0 %v46_v13  ;;  %v118_v20 = vld [vmem:[#allocation4] sm:$0xff]  ;;  %s188_s19 = sshll.u32 %s254_s4, 4  ;;  %s189_s19 = int_to_ptr.vmem [resolvable:$true] %s188_s19 }
   0xd   :  { %210 = vmatmul.msk.f32.vlgmr.msra.gmra.mxu0 %vm34_vm1, %v42_v11  ;;  %v225_v35 = vld [vmem:[%s403_s6] ss:$0 sm:$0xff] }
   0xf   :  { %v119_v34 = vld [vmem:[#allocation4 + $0x8] sm:$0xff] }
  0x12   :  { %215 = vmatmul.msk.f32.gmra.mxu2 %vm34_vm1, %v43_v14 }
  0x13   :  { %213 = vmatmul.msk.f32.gmra.mxu1 %vm34_vm1, %v43_v14 }
  0x88   :  { %v107_v16 = vpop.f32.mrf.mxu1 }
  0x89   :  { %v113_v18 = vadd.f32 %v107_v16, %v84_v15 }
  0x8a   :  { %v74_v19 = vpop.f32.mrf.mxu0 }
  0x8b   :  { %116 = vst.msk [vmem:[#allocation3] sm:$0xff] %vm37_vm0, %v113_v18  ;;  %v80_v21 = vadd.f32 %v74_v19, %v44_v17 }
  0x8d   :  { %v141_v22 = vpop.f32.mrf.mxu2  ;;  %82 = vst.msk [vmem:[#allocation2] sm:$0xff] %vm34_vm1, %v80_v21 }
  0x8e   :  { %v147_v24 = vadd.f32 %v141_v22, %v118_v20 }
  0x8f   :  { %v77_v27 = vpop.f32.mrf.mxu3 }
  0x90   :  { %149 = vst.msk [vmem:[#allocation4] sm:$0xff] %vm37_vm0, %v147_v24  ;;  %v81_v28 = vadd.f32 %v77_v27, %v45_v23  ;;  %v110_v29 = vpop.f32.mrf.mxu1 }
  0x91   :  { %v114_v30 = vadd.f32 %v110_v29, %v85_v25 }
  0x92   :  { %v164_v32 = vld [vmem:[#allocation3] sm:$0xff]  ;;  %83 = vst.msk [vmem:[#allocation2 + $0x8] sm:$0xff] %vm34_vm1, %v81_v28 }
  0x93   :  { %v170_v33 = vadd.f32 %v224_v26, %v164_v32  ;;  %117 = vst.msk [vmem:[#allocation3 + $0x8] sm:$0xff] %vm37_vm0, %v114_v30 }
  0x94   :  { %v154_v36 = vld [vmem:[#allocation2] sm:$0xff] }
  0x95   :  { %172 = vst.msk [vmem:[%s405_s8] sm:$0xff] %vm37_vm0, %v170_v33  ;;  %v144_v37 = vpop.f32.mrf.mxu2  ;;  %v160_v38 = vadd.f32 %v226_v31, %v154_v36 }
  0x96   :  { %v148_v39 = vadd.f32 %v144_v37, %v119_v34 }
  0x97   :  { %v174_v40 = vld [vmem:[#allocation4] sm:$0xff]  ;;  %162 = vst.msk [vmem:[#allocation5] sm:$0xff] %vm34_vm1, %v160_v38 }
  0x98   :  { %v180_v41 = vadd.f32 %v225_v35, %v174_v40  ;;  %150 = vst.msk [vmem:[#allocation4 + $0x8] sm:$0xff] %vm37_vm0, %v148_v39 }
  0x99   :  { %v155_v42 = vld [vmem:[#allocation2 + $0x8] sm:$0xff] }
  0x9a   :  { %182 = vst.msk [vmem:[%s406_s9] sm:$0xff] %vm37_vm0, %v180_v41  ;;  %v165_v43 = vld [vmem:[#allocation3 + $0x8] sm:$0xff]  ;;  %v161_v44 = vadd.f32 %v226_v31, %v155_v42 }
  0x9b   :  { %v171_v45 = vadd.f32 %v224_v26, %v165_v43 }
  0x9c   :  { %163 = vst.msk [vmem:[#allocation5 + $0x8] sm:$0xff] %vm34_vm1, %v161_v44 }
  0x9d   :  { %173 = vst.msk [vmem:[%s405_s8 + $0x8] sm:$0xff] %vm37_vm0, %v171_v45 }
  0x9e   :  { %196 = dma.vmem_to_hbm [thread:$0]  %s189_s19, 256, %s191_s22, [#allocation6], %s255_s7, %s255_s7, %s256_s26  }
  0x9f   :  { %v175_v46 = vld [vmem:[#allocation4 + $0x8] sm:$0xff] }
  0xa0   :  { %v181_v47 = vadd.f32 %v225_v35, %v175_v46 }
  0xa2   :  { %183 = vst.msk [vmem:[%s406_s9 + $0x8] sm:$0xff] %vm37_vm0, %v181_v47 }
  0xa3   :  { %251 = dma.done.wait [#allocation6], 256  }
  0xa4   :  { %252 = vsyncadd [#allocation6], 4294967040 }
  0xa5   :  { %209 = vsyncpa [#allocation6], 1 }

</bundles_post_ra>
